<compile_context>
chip_gen: v6e
topology: v6e:2x2x1
jax: 0.10.0
libtpu: 0.0.40
codegen_flags: <defaults>
</compile_context>

<pallas_src>
import functools

import jax
import jax.numpy as jnp
from jax.experimental import pallas as pl
from jax.experimental.pallas import tpu as pltpu


def _round_up(x, m):
    return (x + m - 1) // m * m


def _cdiv(a, b):
    return -(-a // b)


def _pad_to(x, shape):
    pads = [(0, t - s) for s, t in zip(x.shape, shape)]
    if all(p == (0, 0) for p in pads):
        return x
    return jnp.pad(x, pads)


# ---------------------------------------------------------------------------
# Kernel: one grid step = one lane-dense tile of the output catalog.
# ---------------------------------------------------------------------------
def _mlp_kernel(pooled_ref, w1_ref, b1_ref, w2_ref, b2_ref, wo_ref, bo_ref,
                out_ref, *, chunk):
    # --- front MLP (fc_layers): recomputed per tile; tiny, runs under the
    #     HBM slack of the streamed wo tile, keeps the grid axis 'parallel'.
    x = jnp.dot(pooled_ref[...], w1_ref[...],
                preferred_element_type=jnp.float32) + b1_ref[...]
    x = jnp.maximum(x, 0.0)
    x = jnp.dot(x.astype(w2_ref.dtype), w2_ref[...],
                preferred_element_type=jnp.float32) + b2_ref[...]
    x = jnp.maximum(x, 0.0)
    h = x.astype(wo_ref.dtype)            # (1, l2p) bf16 — cast once per tile

    # --- output layer + sigmoid, chunked over the tile's lanes so only
    #     `chunk` lanes of f32 logits are live at a time (bounded vreg
    #     pressure for large tn). Statically unrolled (Python ints).
    tn = out_ref.shape[-1]
    for off in range(0, tn, chunk):
        sz = min(chunk, tn - off)         # multiple of 128 (tn and chunk are)
        logits = jnp.dot(h, wo_ref[:, pl.ds(off, sz)],
                         preferred_element_type=jnp.float32)
        logits = logits + bo_ref[:, pl.ds(off, sz)]
        out_ref[:, pl.ds(off, sz)] = jax.nn.sigmoid(logits)


# ---------------------------------------------------------------------------
# Wrapper
# ---------------------------------------------------------------------------
def mlp_forward(songs, song_emb, w1, b1, w2, b2, wo, bo, *, tn=8192, chunk=1024):
    """songs: (N,) int indices.  Weights (in,out) layout, biases (1,out).
    Returns the rating vector of shape (n_songs,), float32."""
    d0 = song_emb.shape[1]
    l1, l2 = w1.shape[1], w2.shape[1]
    n_songs = wo.shape[1]

    # --- embedding lookup + mean: a handful of 256-B row gathers and one
    #     reduce. Done in plain XLA (per review): a dedicated pallas_call plus
    #     an HBM round trip for a 512-B hidden vector cost more than the op.
    songs = jnp.clip(songs.astype(jnp.int32), 0, song_emb.shape[0] - 1)
    pooled = jnp.mean(song_emb[songs].astype(jnp.float32), axis=0, keepdims=True)

    # --- exact zero-padding to lane-dense (multiples of 128) shapes.
    d0p = _round_up(d0, 128)
    l1p = _round_up(l1, 128)
    l2p = _round_up(l2, 128)

    pooled_p = _pad_to(pooled, (1, d0p)).astype(jnp.bfloat16)
    w1p = _pad_to(w1, (d0p, l1p))
    b1p = _pad_to(b1, (1, l1p)).astype(jnp.float32)
    w2p = _pad_to(w2, (l1p, l2p))
    b2p = _pad_to(b2, (1, l2p)).astype(jnp.float32)

    # --- generation-aware tile sizing for the output GEMV (wo stream).
    try:
        vmem_cap = int(pltpu.get_tpu_info().vmem_capacity_bytes)
    except Exception:
        vmem_cap = 64 * 1024 * 1024          # conservative: v7x per-TC VMEM

    wo_itemsize = wo.dtype.itemsize
    wo_buf_budget = min(64 << 20, vmem_cap // 2)     # budget for buffered wo tiles
    chunk = max(128, _round_up(int(chunk), 128))

    tn_req = max(128, _round_up(int(tn), 128))                       # caller request, 128-aligned
    tn_max = max(128, (wo_buf_budget // (2 * l2p * wo_itemsize)) // 128 * 128)
    tn_req = min(tn_req, tn_max)

    n_pad128 = _round_up(n_songs, 128)
    # >= 2 tiles whenever the catalog allows, so v7x's two TensorCores both work.
    n_tiles = max(_cdiv(n_pad128, tn_req), 2 if n_pad128 >= 256 else 1)
    tn_eff = _round_up(_cdiv(n_pad128, n_tiles), 128)                # <= tn_req by construction
    n_pad = tn_eff * n_tiles

    wop = _pad_to(wo, (l2p, n_pad))
    bop = _pad_to(bo, (1, n_pad)).astype(jnp.float32)

    # --- pipeline depth: a third wo buffer only when VMEM has room and there
    #     are enough tiles for it to hide anything.
    wo_tile_bytes = l2p * tn_eff * wo_itemsize
    wo_buffers = 3 if (n_tiles >= 4 and 3 * wo_tile_bytes <= wo_buf_budget) else 2
    if wo_buffers == 3:
        wo_spec = pl.BlockSpec((l2p, tn_eff), lambda j: (0, j),
                               pipeline_mode=pl.Buffered(3))
    else:
        wo_spec = pl.BlockSpec((l2p, tn_eff), lambda j: (0, j))

    # --- VMEM limit: actual need * 1.25, clamped to 0.75 * physical VMEM.
    resident_bytes = 2 * ((d0p * l1p + l1p * l2p) * 2 + d0p * 2 + (l1p + l2p) * 4)
    stream_bytes = wo_buffers * wo_tile_bytes + 4 * tn_eff * 4       # wo + bo/out (f32, dbl-buf)
    vmem_limit = int(min(0.75 * vmem_cap,
                         max(8 << 20, 1.25 * (resident_bytes + stream_bytes))))

    cost = pl.CostEstimate(
        flops=2 * l2p * n_pad + n_tiles * 2 * (d0p * l1p + l1p * l2p),
        transcendentals=n_pad,
        bytes_accessed=l2p * n_pad * wo_itemsize + 2 * n_pad * 4 + resident_bytes)

    out = pl.pallas_call(
        functools.partial(_mlp_kernel, chunk=chunk),
        out_shape=jax.ShapeDtypeStruct((1, n_pad), jnp.float32),
        grid=(n_tiles,),
        in_specs=[pl.BlockSpec((1, d0p), lambda j: (0, 0)),      # pooled embedding (resident)
                  pl.BlockSpec((d0p, l1p), lambda j: (0, 0)),    # w1 (resident)
                  pl.BlockSpec((1, l1p), lambda j: (0, 0)),      # b1 (resident)
                  pl.BlockSpec((l1p, l2p), lambda j: (0, 0)),    # w2 (resident)
                  pl.BlockSpec((1, l2p), lambda j: (0, 0)),      # b2 (resident)
                  wo_spec,                                       # wo tile (streamed, pipelined)
                  pl.BlockSpec((1, tn_eff), lambda j: (0, j))],  # bo tile
        out_specs=pl.BlockSpec((1, tn_eff), lambda j: (0, j)),   # lane-dense output tile
        compiler_params=pltpu.CompilerParams(
            dimension_semantics=("parallel",),
            vmem_limit_bytes=vmem_limit),
        cost_estimate=cost,
    )(pooled_p, w1p, b1p, w2p, b2p, wop, bop)

    # Padded columns hold sigmoid(0)=0.5; slice them off immediately.
    return out[0, :n_songs]


# ---------------------------------------------------------------------------
# Reference / demo
# ---------------------------------------------------------------------------
def _init_linear(key, fan_in, fan_out):
    """PyTorch nn.Linear default init: U(-1/sqrt(fan_in), 1/sqrt(fan_in))."""
    k_w, k_b = jax.random.split(key)
    bound = 1.0 / jnp.sqrt(fan_in)
    w = jax.random.uniform(k_w, (fan_in, fan_out), jnp.float32, -bound, bound)
    b = jax.random.uniform(k_b, (1, fan_out), jnp.float32, -bound, bound)
    return w.astype(jnp.bfloat16), b      # bf16 weights, f32 biases


def _reference_forward(songs, song_emb, w1, b1, w2, b2, wo, bo):
    """Pure-JAX reference with the same numerics (bf16 weights, f32 accumulate)."""
    x = jnp.mean(song_emb[songs].astype(jnp.float32), axis=0, keepdims=True)
    x = jnp.maximum(jnp.dot(x.astype(w1.dtype), w1,
                            preferred_element_type=jnp.float32) + b1, 0.0)
    x = jnp.maximum(jnp.dot(x.astype(w2.dtype), w2,
                            preferred_element_type=jnp.float32) + b2, 0.0)
    logits = jnp.dot(x.astype(wo.dtype), wo,
                     preferred_element_type=jnp.float32) + bo
    return jax.nn.sigmoid(logits)[0]


if __name__ == "__main__":
    # Small shapes consistent with the module (layers[0] even).
    n_tags, n_songs = 16, 1000            # n_songs not a tile multiple -> exercises padding
    layers = [128, 64, 128]               # hidden 64 is zero-padded to 128 in the wrapper
    n_batch_songs = 8                     # number of song indices fed to forward()

    key = jax.random.PRNGKey(0)
    k_emb, k_l1, k_l2, k_out, k_idx = jax.random.split(key, 5)

    # nn.Embedding default init: N(0, 1); stored bf16.
    song_emb = jax.random.normal(k_emb, (n_songs, layers[0]),
                                 jnp.float32).astype(jnp.bfloat16)
    w1, b1 = _init_linear(k_l1, layers[0], layers[1])
    w2, b2 = _init_linear(k_l2, layers[1], layers[2])
    wo, bo = _init_linear(k_out, layers[2], n_songs)

    songs = jax.random.randint(k_idx, (n_batch_songs,), 0, n_songs, jnp.int32)

    rating = mlp_forward(songs, song_emb, w1, b1, w2, b2, wo, bo)
    jax.block_until_ready(rating)

    ref = _reference_forward(songs, song_emb, w1, b1, w2, b2, wo, bo)
    assert rating.shape == (n_songs,)
    assert bool(jnp.all(jnp.isfinite(rating)))
    max_err = float(jnp.max(jnp.abs(rating - ref)))
    assert max_err < 2e-3, max_err

    print("KERNEL_OK")
</pallas_src>

<mosaic_0001>
module attributes {stable_mosaic.version = 11 : i64} {
  func.func @_mlp_kernel(%arg0: i32, %arg1: memref<1x128xbf16, #tpu.memory_space<vmem>>, %arg2: memref<128x128xbf16, #tpu.memory_space<vmem>>, %arg3: memref<1x128xf32, #tpu.memory_space<vmem>>, %arg4: memref<128x128xbf16, #tpu.memory_space<vmem>>, %arg5: memref<1x128xf32, #tpu.memory_space<vmem>>, %arg6: memref<128x512xbf16, #tpu.memory_space<vmem>>, %arg7: memref<1x512xf32, #tpu.memory_space<vmem>>, %arg8: memref<1x512xf32, #tpu.memory_space<vmem>>) attributes {dimension_semantics = [#tpu.dimension_semantics<parallel>], iteration_bounds = array<i64: 2>, scalar_prefetch = 0 : i64, scratch_operands = 0 : i64, tpu.core_type = #tpu.core_type<tc>, window_params = [{pipeline_mode = #tpu.pipeline_mode<synchronous>, transform_indices = @transform_0, window_bounds = array<i64: 1, 128>}, {pipeline_mode = #tpu.pipeline_mode<synchronous>, transform_indices = @transform_1, window_bounds = array<i64: 128, 128>}, {pipeline_mode = #tpu.pipeline_mode<synchronous>, transform_indices = @transform_2, window_bounds = array<i64: 1, 128>}, {pipeline_mode = #tpu.pipeline_mode<synchronous>, transform_indices = @transform_3, window_bounds = array<i64: 128, 128>}, {pipeline_mode = #tpu.pipeline_mode<synchronous>, transform_indices = @transform_4, window_bounds = array<i64: 1, 128>}, {transform_indices = @transform_5, window_bounds = array<i64: 128, 512>}, {transform_indices = @transform_6, window_bounds = array<i64: 1, 512>}, {transform_indices = @transform_7, window_bounds = array<i64: 1, 512>}]} {
    %c0 = arith.constant 0 : index
    %c0_0 = arith.constant 0 : index
    %0 = vector.load %arg1[%c0, %c0_0] : memref<1x128xbf16, #tpu.memory_space<vmem>>, vector<1x128xbf16>
    %c0_1 = arith.constant 0 : index
    %c0_2 = arith.constant 0 : index
    %1 = vector.load %arg2[%c0_1, %c0_2] : memref<128x128xbf16, #tpu.memory_space<vmem>>, vector<128x128xbf16>
    %cst = arith.constant dense<0.000000e+00> : vector<1x128xf32>
    %2 = tpu.matmul %0, %1, %cst {dimension_numbers = #tpu.dot_dimension_numbers<[1], [0], [0], [1], [0, 0, 1, 1], [], []>} : vector<1x128xbf16>, vector<128x128xbf16>, vector<1x128xf32> -> vector<1x128xf32>
    %c0_3 = arith.constant 0 : index
    %c0_4 = arith.constant 0 : index
    %3 = vector.load %arg3[%c0_3, %c0_4] : memref<1x128xf32, #tpu.memory_space<vmem>>, vector<1x128xf32>
    %4 = arith.addf %2, %3 : vector<1x128xf32>
    %cst_5 = arith.constant 0.000000e+00 : f32
    %5 = vector.broadcast %cst_5 : f32 to vector<1x128xf32>
    %6 = arith.maximumf %4, %5 : vector<1x128xf32>
    %7 = arith.truncf %6 : vector<1x128xf32> to vector<1x128xbf16>
    %c0_6 = arith.constant 0 : index
    %c0_7 = arith.constant 0 : index
    %8 = vector.load %arg4[%c0_6, %c0_7] : memref<128x128xbf16, #tpu.memory_space<vmem>>, vector<128x128xbf16>
    %cst_8 = arith.constant dense<0.000000e+00> : vector<1x128xf32>
    %9 = tpu.matmul %7, %8, %cst_8 {dimension_numbers = #tpu.dot_dimension_numbers<[1], [0], [0], [1], [0, 0, 1, 1], [], []>} : vector<1x128xbf16>, vector<128x128xbf16>, vector<1x128xf32> -> vector<1x128xf32>
    %c0_9 = arith.constant 0 : index
    %c0_10 = arith.constant 0 : index
    %10 = vector.load %arg5[%c0_9, %c0_10] : memref<1x128xf32, #tpu.memory_space<vmem>>, vector<1x128xf32>
    %11 = arith.addf %9, %10 : vector<1x128xf32>
    %cst_11 = arith.constant 0.000000e+00 : f32
    %12 = vector.broadcast %cst_11 : f32 to vector<1x128xf32>
    %13 = arith.maximumf %11, %12 : vector<1x128xf32>
    %14 = arith.truncf %13 : vector<1x128xf32> to vector<1x128xbf16>
    %c0_12 = arith.constant 0 : index
    %c0_13 = arith.constant 0 : index
    %15 = vector.load %arg6[%c0_12, %c0_13] : memref<128x512xbf16, #tpu.memory_space<vmem>>, vector<128x512xbf16>
    %cst_14 = arith.constant dense<0.000000e+00> : vector<1x512xf32>
    %16 = tpu.matmul %14, %15, %cst_14 {dimension_numbers = #tpu.dot_dimension_numbers<[1], [0], [0], [1], [0, 0, 1, 1], [], []>} : vector<1x128xbf16>, vector<128x512xbf16>, vector<1x512xf32> -> vector<1x512xf32>
    %c0_15 = arith.constant 0 : index
    %c0_16 = arith.constant 0 : index
    %17 = vector.load %arg7[%c0_15, %c0_16] : memref<1x512xf32, #tpu.memory_space<vmem>>, vector<1x512xf32>
    %18 = arith.addf %16, %17 : vector<1x512xf32>
    %19 = arith.negf %18 : vector<1x512xf32>
    %20 = math.exp %19 : vector<1x512xf32>
    %cst_17 = arith.constant 1.000000e+00 : f32
    %21 = vector.broadcast %cst_17 : f32 to vector<1x512xf32>
    %22 = arith.addf %21, %20 : vector<1x512xf32>
    %23 = arith.divf %21, %22 : vector<1x512xf32>
    %c0_18 = arith.constant 0 : index
    %c0_19 = arith.constant 0 : index
    %24 = vector.load %arg8[%c0_18, %c0_19] : memref<1x512xf32, #tpu.memory_space<vmem>>, vector<1x512xf32>
    tpu.vector_store %arg8[%c0_18, %c0_19], %23 {strides = array<i32>} : memref<1x512xf32, #tpu.memory_space<vmem>>, vector<1x512xf32>,
    return
  }
  func.func @transform_0(%arg0: i32) -> (i32, i32) {
    %c0_i32 = arith.constant 0 : i32
    %c0_i32_0 = arith.constant 0 : i32
    %c0_i32_1 = arith.constant 0 : i32
    return %c0_i32, %c0_i32_0 : i32, i32
  }
  func.func @transform_1(%arg0: i32) -> (i32, i32) {
    %c0_i32 = arith.constant 0 : i32
    %c0_i32_0 = arith.constant 0 : i32
    %c0_i32_1 = arith.constant 0 : i32
    return %c0_i32, %c0_i32_0 : i32, i32
  }
  func.func @transform_2(%arg0: i32) -> (i32, i32) {
    %c0_i32 = arith.constant 0 : i32
    %c0_i32_0 = arith.constant 0 : i32
    %c0_i32_1 = arith.constant 0 : i32
    return %c0_i32, %c0_i32_0 : i32, i32
  }
  func.func @transform_3(%arg0: i32) -> (i32, i32) {
    %c0_i32 = arith.constant 0 : i32
    %c0_i32_0 = arith.constant 0 : i32
    %c0_i32_1 = arith.constant 0 : i32
    return %c0_i32, %c0_i32_0 : i32, i32
  }
  func.func @transform_4(%arg0: i32) -> (i32, i32) {
    %c0_i32 = arith.constant 0 : i32
    %c0_i32_0 = arith.constant 0 : i32
    %c0_i32_1 = arith.constant 0 : i32
    return %c0_i32, %c0_i32_0 : i32, i32
  }
  func.func @transform_5(%arg0: i32) -> (i32, i32) {
    %c0_i32 = arith.constant 0 : i32
    %c0_i32_0 = arith.constant 0 : i32
    return %c0_i32, %arg0 : i32, i32
  }
  func.func @transform_6(%arg0: i32) -> (i32, i32) {
    %c0_i32 = arith.constant 0 : i32
    %c0_i32_0 = arith.constant 0 : i32
    return %c0_i32, %arg0 : i32, i32
  }
  func.func @transform_7(%arg0: i32) -> (i32, i32) {
    %c0_i32 = arith.constant 0 : i32
    %c0_i32_0 = arith.constant 0 : i32
    return %c0_i32, %arg0 : i32, i32
  }
}

</mosaic_0001>

<bundles_post_ra>
// kernel: tpu_custom_call.1
= control target key start
LH: loop header
LB: loop body
LE: loop exit
PB: predicated region body
PF: predicated region fallthrough
CT: control target
= control target key end

     0   :  { %s1831_s0 = inlined_call_operand.hbm [shape: bf16[1,128], index: 0, kind: input, shape index: {}]   ;;  %s1832_s1 = inlined_call_operand.hbm [shape: bf16[128,128], index: 1, kind: input, shape index: {}]   ;;  %s1833_s2 = inlined_call_operand.vmem [shape: f32[1,128], index: 2, kind: input, shape index: {}]   ;;  %s1834_s3 = inlined_call_operand.hbm [shape: bf16[128,128], index: 3, kind: input, shape index: {}]   ;;  %s1835_s4 = inlined_call_operand.vmem [shape: f32[1,128], index: 4, kind: input, shape index: {}]   ;;  %s1836_s5 = inlined_call_operand.hbm [shape: bf16[128,1024], index: 5, kind: input, shape index: {}]   ;;  %s1837_s6 = inlined_call_operand.vmem [shape: f32[1,1024], index: 6, kind: input, shape index: {}]   ;;  %s1838_s7 = inlined_call_operand.hbm [shape: f32[1,1024], index: 7, kind: output, shape index: {}]  }
   0x1   :  { %1844 = sst [smem:[#allocation16_spill]] %s1831_s0 }
   0x2   :  { %1845 = sst [smem:[#allocation17_spill]] %s1832_s1 }
   0x3   :  { %12 = vsyncpa [#allocation3], 0 }
   0x4   :  { %13 = vsyncpa [#allocation6], 0 }
   0x5   :  { %14 = vsyncpa [#allocation9], 0 }
   0x6   :  { %16 = vsyncpa [#allocation9 + $0x1], 0 }
   0x7   :  { %17 = vsyncpa [#allocation4], 0 }
   0x8   :  { %19 = vsyncpa [#allocation4 + $0x1], 0  ;;  %s1588_s24 = smov 0   ;;  %s1590_s25 = smov 0  }
   0x9   :  { %s1592_s26 = smov 0   ;;  %s1594_s27 = smov 0  }
   0xa LB: > { %s1609_s28 = sadd.s32 4294967295, %s1532_s27   ;;  %s1055_s29 = sadd.s32 4294967294, %s1532_s27   ;;  %s1532_s27 = sphi %s1594_s27, %s1870_s27   ;;  %s1528_s26 = sphi %s1592_s26, %s1869_s26   ;;  %s1524_s25 = sphi %s1590_s25, %s1868_s25   ;;  %s1520_s24 = sphi %s1588_s24, %s1867_s24  }
   0xb   : > { %s1613_s30 = sadd.s32 1, %s1532_s27   ;;  %s137_s8 = sadd.s32 1, %s1528_s26 }
   0xc   : > { %s134_s9 = ssub.s32 %s1532_s27, %s1613_s30  ;;  %p144_p0 = scmp.ne.s32.totalorder %s1528_s26, %s1524_s25 }
   0xd   : > { %p135_p1 = scmp.eq.s32.totalorder %s134_s9, 0  ;;  %p145_p2 = scmp.eq.s32.totalorder %s1532_s27, 0 }
   0xe   : > { %p150_p3 = scmp.ne.s32.totalorder %s1524_s25, %s1520_s24  ;;  %p1840_p4 = scmp.eq.s32.totalorder %s1609_s28, 0 }
   0xf   : > { %s1625_s10 = scalar_select %p135_p1, %s1528_s26, %s137_s8  }
  0x10   : > { %p1627_p5 = por %p145_p2, %p144_p0  ;;  %p1633_p6 = por %p1840_p4, %p150_p3 }
  0x11   : > { %1846 = sst [smem:[#allocation15_spill]] %s1625_s10  ;;  %p200_p7 = scmp.eq.s32.totalorder %s1609_s28, 1 }
  0x12   : > { %s1848_s12 = scalar_select %p1633_p6, 1, 0 }
  0x13   : > { %p206_p8 = scmp.eq.s32.totalorder %s1055_s29, 1  ;;  %p1056_p9 = scmp.ge.s32.totalorder %s1532_s27, 1 }
  0x14   : > { %p213_p10 = scmp.lt.s32.totalorder %s1532_s27, 3  ;;  %p1640_p11 = por %p200_p7, %p144_p0 }
  0x15   : > { %p1644_p12 = por %p206_p8, %p150_p3  ;;  %s1534_s16 = smov [#allocation5]  }
  0x16   : > { %s1849_s13 = scalar_select %p1640_p11, 1, 0 }
  0x17   : > { %s1850_s14 = scalar_select %p1644_p12, 1, 0 }
  0x18   : > { %p1648_p13 = pnand %p1056_p9, %p213_p10  ;;  %s236_s17 = sshll.u32 %s1534_s16, 4  ;;  %s237_s17 = int_to_ptr.vmem [resolvable:$true] %s236_s17 }
  0x19   : > { %p1225_p3 = scmp.lt.s32.totalorder %s1532_s27, 2  ;;  %s1535_s19 = smov [#allocation2]  }
  0x1a   : > { %s1851_s15 = scalar_select %p1648_p13, 1, 0 }
  0x1b   : > { %p1204_p1 = pneg %p1648_p13  ;;  %s226_s20 = sshll.u32 %s1535_s19, 4  ;;  %s227_s20 = int_to_ptr.vmem [resolvable:$true] %s226_s20 }
  0x1c   : > { %s1365_s21 = scalar_lea.vmem %s237_s17, 1024  ;;  %p1373_p12 = scmp.lt.s32.totalorder %s237_s17, %s237_s17 }
  0x1d   : > { %p1656_p2 = pnand %p1204_p1, %p1840_p4  ;;  %p1366_p8 = scmp.ne.s32.totalorder %s237_s17, %s1365_s21 }
  0x1e   : > { %p1374_p11 = scmp.lt.s32.totalorder %s1365_s21, %s1365_s21 }
  0x1f   : > { %p1356_p7 = pneg %p1656_p2 }
  0x20   : > { %p1375_p1 = por %p1374_p11, %p1373_p12 }
  0x21   : > { %p1368_p9 = pnand %p1366_p8, %p1356_p7 }
  0x23   : > { %p1369_p10 = pneg %p1368_p9 }
  0x25   : > { %p1376_p4 = pnand %p1375_p1, %p1369_p10 }
  0x27   : > { %1379 = shalt.err (!%p1376_p4)
}
  0x28   : > { %s1841_s22 = smov 64   ;;  %s1537_s23 = smov 4  }
  0x29   : > { %s1853_s1 = sld [smem:[#allocation17_spill]]  ;;  %p1679_p8 = pnand %p1225_p3, %p1627_p5 }
  0x2a   : > { %s1391_s16 = scalar_lea.vmem %s227_s20, 16  ;;  %s1398_s19 = scalar_lea.vmem %s227_s20, 32 }
  0x2b   : > { %p1392_p4 = scmp.ne.s32.totalorder %s227_s20, %s1391_s16  ;;  %p1399_p9 = scmp.lt.s32.totalorder %s227_s20, %s227_s20 }
  0x2c   : > { %p1400_p10 = scmp.lt.s32.totalorder %s1398_s19, %s1391_s16 }
  0x2d   : > { %p1394_p11 = pnand %p1392_p4, %p1356_p7 }
  0x2e   : > { %p1401_p1 = por %p1400_p10, %p1399_p9 }
  0x2f   : > { %1210 = dma.hbm_to_vmem [thread:$0]  (!%p1656_p2), %s1853_s1, 1024, %s237_s17, [#allocation6], %s1841_s22, %s1841_s22, %s1537_s23  }
  0x30   : > { %p1395_p12 = pneg %p1394_p11 }
  0x32   : > { %p1402_p0 = pnand %p1401_p1, %p1395_p12 }
  0x34   : > { %1405 = shalt.err (!%p1402_p0)
}
  0x35   : > { %s1855_s0 = sld [smem:[#allocation16_spill]]  ;;  %s1538_s21 = smov [#allocation7]  }
  0x36   : > { %s252_s29 = sshll.u32 %s1538_s21, 4  ;;  %s269_s8 = sand.u32 1, %s1528_s26   ;;  %s253_s29 = int_to_ptr.vmem [resolvable:$true] %s252_s29 }
  0x37   : > { %s1417_s22 = scalar_lea.vmem %s253_s29, 1024  ;;  %p1425_p11 = scmp.lt.s32.totalorder %s253_s29, %s253_s29 }
  0x38   : > { %p1418_p5 = scmp.ne.s32.totalorder %s253_s29, %s1417_s22  ;;  %p1426_p0 = scmp.lt.s32.totalorder %s1417_s22, %s1417_s22 }
  0x3a   : > { %p1420_p3 = pnand %p1418_p5, %p1356_p7  ;;  %p1427_p12 = por %p1426_p0, %p1425_p11 }
  0x3b   : > { %1207 = dma.hbm_to_vmem [thread:$0]  (!%p1656_p2), %s1855_s0, 16, %s227_s20, [#allocation3]  }
  0x3c   : > { %p1421_p4 = pneg %p1420_p3 }
  0x3e   : > { %p1428_p9 = pnand %p1427_p12, %p1421_p4 }
  0x40   : > { %1431 = shalt.err (!%p1428_p9)
}
  0x41   : > { %s1856_s16 = smov 64   ;;  %s1061_s11 = sshll.u32 %s269_s8, 8 }
  0x42   : > { %1213 = dma.hbm_to_vmem [thread:$0]  (!%p1656_p2), %s1834_s3, 1024, %s253_s29, [#allocation6], %s1856_s16, %s1856_s16, %s1537_s23  }
  0x43   : > { %s1128_s17 = sshll.u32 %s1532_s27, 8  ;;  %s273_s18 = scalar_lea.vmem [#allocation8], %s1061_s11 }
  0x44   : > { %s1707_s22 = scalar_lea.hbm %s1836_s5, %s1128_s17  ;;  %s280_s1 = sshll.u32 %s273_s18, 4  ;;  %s1709_s1 = int_to_ptr.vmem [resolvable:$true] %s280_s1 }
  0x45   : > { %s1711_s10 = scalar_lea.sflag [#allocation9], %s269_s8  ;;  %s1432_s20 = scalar_lea.hbm %s1707_s22, 4096 }
  0x46   : > { %p1433_p7 = scmp.ne.s32.totalorder %s1707_s22, %s1432_s20  ;;  %p1434_p2 = pneg %p1679_p8 }
  0x47   : > { %s1437_s0 = scalar_lea.hbm %s1836_s5, 8192  ;;  %p1438_p5 = scmp.lt.s32.totalorder %s1707_s22, %s1836_s5 }
  0x48   : > { %p1435_p10 = pnand %p1434_p2, %p1433_p7  ;;  %p1439_p3 = scmp.lt.s32.totalorder %s1437_s0, %s1432_s20 }
  0x4a   : > { %p1436_p1 = pneg %p1435_p10  ;;  %p1440_p4 = por %p1439_p3, %p1438_p5 }
  0x4c   : > { %p1441_p11 = pnand %p1440_p4, %p1436_p1 }
  0x4e   : > { %1444 = shalt.err (!%p1441_p11)
}
  0x4f   : > { %s1445_s8 = scalar_lea.vmem %s1709_s1, 4096  ;;  %s1539_s11 = smov [#allocation8]  }
  0x50   : > { %p1446_p0 = scmp.ne.s32.totalorder %s1709_s1, %s1445_s8  ;;  %s1450_s17 = sshll.u32 %s1539_s11, 4  ;;  %s1451_s17 = int_to_ptr.vmem [resolvable:$false] %s1450_s17 }
  0x51   : > { %s1452_s21 = scalar_lea.vmem %s1451_s17, 8192  ;;  %p1453_p7 = scmp.lt.s32.totalorder %s1709_s1, %s1451_s17 }
  0x52   : > { %p1448_p12 = pnand %p1446_p0, %p1434_p2  ;;  %p1454_p10 = scmp.lt.s32.totalorder %s1452_s21, %s1445_s8 }
  0x54   : > { %p1449_p9 = pneg %p1448_p12  ;;  %p1455_p6 = por %p1454_p10, %p1453_p7 }
  0x56   : > { %p1456_p13 = pnand %p1455_p6, %p1449_p9 }
  0x58   : > { %1459 = shalt.err (!%p1456_p13)
}
  0x59   : > { %s1540_s18 = smov 512   ;;  %s1541_s20 = smov 256  }
  0x5a   : > { %s1542_s23 = smov 16   ;;  %p1857_p2 = scmp.ne.s32.totalorder %s1851_s15, 0 }
  0x5b   : > { %1217 = dma.hbm_to_vmem [thread:$0]  (!%p1679_p8), %s1707_s22, 4096, %s1709_s1, %s1711_s10, %s1540_s18, %s1541_s20, %s1542_s23  }
  0x5c   : > { %300 = sbr.rel (%p1857_p2) target bundleno = 788 (0x314), region = 48  ;;  %p1858_p1 = scmp.eq.s32.totalorder (!%p1857_p2), %s1609_s28, 0 }
  0x61   : > { %1503 = dma.done.wait (%p1858_p1), [#allocation3], 16   ;;  %p1859_p5 = pmov %p1858_p1 }
  0x62   : > { %p1860_p6 = pmov %p1858_p1 }
  0x63   : > { %1505 = vsyncadd (%p1859_p5), [#allocation3], 4294967280 }
  0x64   : > { %1507 = dma.done.wait (%p1860_p6), [#allocation6], 2048   ;;  %p1861_p13 = pmov %p1858_p1 }
  0x65   : > { %s1743_s29 = sand.u32 1, %s1524_s25   ;;  %p1862_p8 = scmp.ne.s32.totalorder %s1848_s12, 0 }
  0x66   : > { %1509 = vsyncadd (%p1861_p13), [#allocation6], 4294965248  ;;  %s1068_s1 = sshll.u32 %s1743_s29, 8  ;;  %s315_s10 = scalar_lea.sflag [#allocation9], %s1743_s29 }
  0x67   : > { %s1747_s15 = scalar_lea.vmem [#allocation8], %s1068_s1 }
  0x68   : > { %1511 = dma.done.wait (%p1862_p8), %s315_s10, 4096  }
  0x69   : > { %1513 = vsyncadd (%p1862_p8), %s315_s10, 4294963200  ;;  %v1543_v0 = vmov 0.0   ;;  %vm1544_vm0 = vmmov 0   ;;  %v1274_v1 = vld [vmem:[#allocation5 + $0x38] sm:$0xff]   ;;  %v1275_v2 = vld [vmem:[#allocation5 + $0x30] sm:$0xff]   ;;  %v1545_v58 = vmov 0  }
  0x6a   : > { %1148 = vmatprep.subr.bf16.mxu0 %v1543_v0  ;;  %1164 = vmatprep.mubr.msk.bf16.mxu0 %vm1544_vm0, %v1543_v0  ;;  %v1276_v3 = vld [vmem:[#allocation5 + $0x28] sm:$0xff]   ;;  %v1282_v4 = vld [vmem:[#allocation7 + $0x38] sm:$0xff]   ;;  %v1277_v5 = vld [vmem:[#allocation5 + $0x20] sm:$0xff]   ;;  %s1070_s16 = sshll.u32 %s1609_s28, 2  ;;  %s1069_s17 = sshll.u32 %s1743_s29, 2 }
  0x6b   : > { %1168 = vmatprep.subr.bf16.mxu1 %v1543_v0  ;;  %1184 = vmatprep.mubr.msk.bf16.mxu1 %vm1544_vm0, %v1543_v0  ;;  %v1283_v6 = vld [vmem:[#allocation7 + $0x30] sm:$0xff]   ;;  %v1278_v7 = vld [vmem:[#allocation5 + $0x18] sm:$0xff]   ;;  %v1284_v8 = vld [vmem:[#allocation7 + $0x28] sm:$0xff]   ;;  %p355_p3 = scmp.lt.s32.totalorder %s1070_s16, 7  ;;  %s1129_s21 = sshll.u32 %s1609_s28, 6 }
  0x6c   : > { %1149 = vmatpush3.bf16.msra.mxu0 %v1274_v1  ;;  %1169 = vmatpush3.bf16.msra.mxu1 %v1282_v4  ;;  %v1279_v9 = vld [vmem:[#allocation5 + $0x10] sm:$0xff]   ;;  %v1285_v10 = vld [vmem:[#allocation7 + $0x20] sm:$0xff]   ;;  %v1280_v11 = vld [vmem:[#allocation5 + $0x8] sm:$0xff]   ;;  %s352_s18 = scalar_lea.vmem [#allocation10], %s1069_s17  ;;  %s943_s10 = scalar_lea.hbm %s1838_s7, %s1129_s21 }
  0x6d   : > { %1150 = vmatprep.subr.bf16.mxu0 %v1543_v0  ;;  %1170 = vmatprep.subr.bf16.mxu1 %v1543_v0  ;;  %v1286_v12 = vld [vmem:[#allocation7 + $0x18] sm:$0xff]   ;;  %v1281_v13 = vld [vmem:[#allocation5] sm:$0xff]   ;;  %v1287_v14 = vld [vmem:[#allocation7 + $0x10] sm:$0xff]   ;;  %s1872_s16 = smov (!%p355_p3, %s1070_s16), 7  ;;  %s945_s20 = sshll.u32 %s352_s18, 4  ;;  %s946_s20 = int_to_ptr.vmem [resolvable:$true] %s945_s20 }
  0x6e   : > { %v361_v15 = vld [vmem:[#allocation2] sm:$0x1]  ;;  %v1288_v16 = vld [vmem:[#allocation7 + $0x8] sm:$0xff]   ;;  %v1289_v17 = vld [vmem:[#allocation7] sm:$0xff]   ;;  %s357_s11 = scalar_lea.vmem %s1837_s6, %s1872_s16  ;;  %s1460_s12 = scalar_lea.vmem %s946_s20, 64 }
  0x6f   : > { %v1290_v18 = vld [vmem:[%s1747_s15 + $0xe0] ss:$16 sps:$4 sm:$0xff]   ;;  %v1292_v19 = vld [vmem:[%s1747_s15 + $0xe4] ss:$16 sps:$4 sm:$0xff]   ;;  %v1295_v20 = vld [vmem:[%s1747_s15 + $0xec] ss:$16 sps:$4 sm:$0xff]   ;;  %p1461_p4 = scmp.ne.s32.totalorder %s946_s20, %s1460_s12 }
  0x70   : > { %1151 = vmatpush3.bf16.msra.mxu0 %v1275_v2  ;;  %1171 = vmatpush3.bf16.msra.mxu1 %v1283_v6  ;;  %v1298_v21 = vld [vmem:[%s1747_s15 + $0xc4] ss:$16 sps:$4 sm:$0xff]   ;;  %v1296_v22 = vld [vmem:[%s1747_s15 + $0xc0] ss:$16 sps:$4 sm:$0xff]   ;;  %v1293_v39 = vld [vmem:[%s1747_s15 + $0xe8] ss:$16 sps:$4 sm:$0xff]  }
  0x71   : > { %1152 = vmatprep.subr.bf16.mxu0 %v1543_v0  ;;  %1172 = vmatprep.subr.bf16.mxu1 %v1543_v0  ;;  %v1304_v23 = vld [vmem:[%s1747_s15 + $0xa4] ss:$16 sps:$4 sm:$0xff]   ;;  %v1302_v24 = vld [vmem:[%s1747_s15 + $0xa0] ss:$16 sps:$4 sm:$0xff]   ;;  %v1301_v41 = vld [vmem:[%s1747_s15 + $0xcc] ss:$16 sps:$4 sm:$0xff]  }
  0x72   : > { %v1310_v25 = vld [vmem:[%s1747_s15 + $0x84] ss:$16 sps:$4 sm:$0xff]   ;;  %v1308_v26 = vld [vmem:[%s1747_s15 + $0x80] ss:$16 sps:$4 sm:$0xff]   ;;  %v1299_v43 = vld [vmem:[%s1747_s15 + $0xc8] ss:$16 sps:$4 sm:$0xff]  }
  0x73   : > { %v1316_v27 = vld [vmem:[%s1747_s15 + $0x64] ss:$16 sps:$4 sm:$0xff]   ;;  %v1314_v28 = vld [vmem:[%s1747_s15 + $0x60] ss:$16 sps:$4 sm:$0xff]   ;;  %v1307_v44 = vld [vmem:[%s1747_s15 + $0xac] ss:$16 sps:$4 sm:$0xff]  }
  0x74   : > { %1153 = vmatpush3.bf16.msra.mxu0 %v1276_v3  ;;  %1173 = vmatpush3.bf16.msra.mxu1 %v1284_v8  ;;  %v1322_v29 = vld [vmem:[%s1747_s15 + $0x44] ss:$16 sps:$4 sm:$0xff]   ;;  %v1320_v30 = vld [vmem:[%s1747_s15 + $0x40] ss:$16 sps:$4 sm:$0xff]   ;;  %v1305_v45 = vld [vmem:[%s1747_s15 + $0xa8] ss:$16 sps:$4 sm:$0xff]   ;;  %v770_v3 = vlaneseq }
  0x75   : > { %1154 = vmatprep.subr.bf16.mxu0 %v1543_v0  ;;  %1174 = vmatprep.subr.bf16.mxu1 %v1543_v0  ;;  %v1328_v31 = vld [vmem:[%s1747_s15 + $0x24] ss:$16 sps:$4 sm:$0xff]   ;;  %v1326_v32 = vld [vmem:[%s1747_s15 + $0x20] ss:$16 sps:$4 sm:$0xff]   ;;  %v1313_v46 = vld [vmem:[%s1747_s15 + $0x8c] ss:$16 sps:$4 sm:$0xff]  }
  0x76   : > { %v378_v33 = vld [vmem:[%s1833_s2] sm:$0x1]  ;;  %v1311_v47 = vld [vmem:[%s1747_s15 + $0x88] ss:$16 sps:$4 sm:$0xff]   ;;  %v1319_v48 = vld [vmem:[%s1747_s15 + $0x6c] ss:$16 sps:$4 sm:$0xff]  }
  0x77   : > { %v1317_v49 = vld [vmem:[%s1747_s15 + $0x68] ss:$16 sps:$4 sm:$0xff]   ;;  %v1325_v50 = vld [vmem:[%s1747_s15 + $0x4c] ss:$16 sps:$4 sm:$0xff]   ;;  %v1334_v54 = vld [vmem:[%s1747_s15 + $0x4] ss:$16 sps:$4 sm:$0xff]  }
  0x78   : > { %1155 = vmatpush3.bf16.msra.mxu0 %v1277_v5  ;;  %1175 = vmatpush3.bf16.msra.mxu1 %v1285_v10  ;;  %v1323_v51 = vld [vmem:[%s1747_s15 + $0x48] ss:$16 sps:$4 sm:$0xff]   ;;  %v1331_v52 = vld [vmem:[%s1747_s15 + $0x2c] ss:$16 sps:$4 sm:$0xff]   ;;  %v1332_v56 = vld [vmem:[%s1747_s15] ss:$16 sps:$4 sm:$0xff]  }
  0x79   : > { %1156 = vmatprep.subr.bf16.mxu0 %v1543_v0  ;;  %1176 = vmatprep.subr.bf16.mxu1 %v1543_v0  ;;  %v1329_v53 = vld [vmem:[%s1747_s15 + $0x28] ss:$16 sps:$4 sm:$0xff]   ;;  %v1337_v55 = vld [vmem:[%s1747_s15 + $0xc] ss:$16 sps:$4 sm:$0xff]   ;;  %v485_v59 = vld [vmem:[%s1835_s4] sm:$0x1] }
  0x7a   : > { %v1335_v57 = vld [vmem:[%s1747_s15 + $0x8] ss:$16 sps:$4 sm:$0xff]   ;;  %v771_v4 = vshrl.u32 %v770_v3, 7  ;;  %vm927_vm1 = vcmp.lt.s32.totalorder %v770_v3, 512  ;;  %s931_s15 = scalar_lea.sflag [#allocation4], %s1743_s29  ;;  %p1863_p11 = scmp.ne.s32.totalorder %s1849_s13, 0 }
  0x7b   : > { %s1547_s9 = smov [#allocation10]  }
  0x7c   : > { %1157 = vmatpush3.bf16.msra.mxu0 %v1278_v7  ;;  %1177 = vmatpush3.bf16.msra.mxu1 %v1286_v12  ;;  %v772_v5 = vsub.s32 0, %v771_v4  ;;  %v780_v6 = vsub.s32 2, %v771_v4  ;;  %v608_v7 = vld [vmem:[%s357_s11] sm:$0xf]  ;;  %v776_v8 = vsub.s32 1, %v771_v4  ;;  %p1462_p0 = pnand %p1461_p4, %p1863_p11  ;;  %s1464_s22 = sshll.u32 %s1547_s9, 4  ;;  %s1465_s22 = int_to_ptr.vmem [resolvable:$false] %s1464_s22 }
  0x7d   : > { %1158 = vmatprep.subr.bf16.mxu0 %v1543_v0  ;;  %1178 = vmatprep.subr.bf16.mxu1 %v1543_v0  ;;  %s1466_s28 = scalar_lea.vmem %s1465_s22, 128  ;;  %p1467_p9 = scmp.lt.s32.totalorder %s946_s20, %s1465_s22 }
  0x7e   : > { %v773_v10 = vrot.slane %v608_v7, %v772_v5  ;;  %v777_v12 = vrot.slane %v608_v7, %v776_v8  ;;  %p1463_p12 = pneg %p1462_p0  ;;  %p1468_p7 = scmp.lt.s32.totalorder %s1466_s28, %s1460_s12 }
  0x80   : > { %1159 = vmatpush3.bf16.msra.mxu0 %v1279_v9  ;;  %1179 = vmatpush3.bf16.msra.mxu1 %v1287_v14  ;;  %v784_v9 = vsub.s32 3, %v771_v4  ;;  %p1469_p10 = por %p1468_p7, %p1467_p9 }
  0x81   : > { %1160 = vmatprep.subr.bf16.mxu0 %v1543_v0  ;;  %1180 = vmatprep.subr.bf16.mxu1 %v1543_v0 }
  0x82   : > { %p1470_p2 = pnand %p1469_p10, %p1463_p12 }
  0x84   : > { %1161 = vmatpush3.bf16.msra.mxu0 %v1280_v11  ;;  %1181 = vmatpush3.bf16.msra.mxu1 %v1288_v16  ;;  %v781_v11 = vrot.slane %v608_v7, %v780_v6 }
  0x85   : > { %1162 = vmatprep.subr.bf16.mxu0 %v1543_v0  ;;  %1182 = vmatprep.subr.bf16.mxu1 %v1543_v0 }
  0x88   : > { %1163 = vmatpush3.bf16.msra.mxu0 %v1281_v13  ;;  %1183 = vmatpush3.bf16.msra.mxu1 %v1289_v17  ;;  %v785_v13 = vrot.slane %v608_v7, %v784_v9 }
  0x89   : > { %790 = vmatprep.subr.bf16.mxu0 %v1292_v19  ;;  %831 = vmatprep.subr.bf16.mxu1 %v1295_v20 }
  0x8b   : > { %1165 = vmatmul.mubr.bf16.vlgmr.msra.gmra.mxu0 %v361_v15 }
  0x8c   : > { %791 = vmatpush1.bf16.msra.mxu0 %v1290_v18  ;;  %822 = vmatprep.mubr.bf16.mxu0 %v1545_v58 }
  0x8d   : > { %792 = vmatprep.subr.bf16.mxu0 %v1298_v21 }
  0x90   : > { %793 = vmatpush1.bf16.msra.mxu0 %v1296_v22 }
  0x91   : > { %794 = vmatprep.subr.bf16.mxu0 %v1304_v23 }
  0x94   : > { %795 = vmatpush1.bf16.msra.mxu0 %v1302_v24 }
  0x95   : > { %796 = vmatprep.subr.bf16.mxu0 %v1310_v25 }
  0x98   : > { %797 = vmatpush1.bf16.msra.mxu0 %v1308_v26 }
  0x99   : > { %798 = vmatprep.subr.bf16.mxu0 %v1316_v27 }
  0x9c   : > { %799 = vmatpush1.bf16.msra.mxu0 %v1314_v28 }
  0x9d   : > { %800 = vmatprep.subr.bf16.mxu0 %v1322_v29 }
  0xa0   : > { %801 = vmatpush1.bf16.msra.mxu0 %v1320_v30 }
  0xa1   : > { %802 = vmatprep.subr.bf16.mxu0 %v1328_v31 }
  0xa4   : > { %803 = vmatpush1.bf16.msra.mxu0 %v1326_v32 }
  0xa5   : > { %804 = vmatprep.subr.bf16.mxu0 %v1334_v54 }
  0xa8   : > { %805 = vmatpush1.bf16.msra.mxu0 %v1332_v56 }
 0x14b   : > { %v461_v34 = vpop.f32.mrf.mxu0 }
 0x14c   : > { %v462_v35 = vadd.f32 %v461_v34, %v378_v33 }
 0x14d   : > { %v1166_v36 = vpop.f32.mrf.mxu0 }
 0x14e   : > { %v467_v37 = vmax.f32 %v462_v35, 0.0 }
 0x14f   : > { %v464_v38 = vpop.f32.mrf.mxu0 }
 0x150   : > { %v468_v40 = vpack.c.bf16 %v467_v37, %v467_v37  ;;  %v1546_v38 = vmov 1966171168  }
 0x151   : > { %v1167_v42 = vpop.f32.mrf.mxu0 }
 0x152   : > { %1185 = vmatmul.mubr.bf16.vlgmr.msra.gmra.mxu1 %v468_v40 }
 0x153   : > { %832 = vmatpush1.bf16.msra.mxu1 %v1293_v39  ;;  %863 = vmatprep.mubr.bf16.mxu1 %v1545_v58  ;;  %v903_v39 = vunpack.c.l.s4 %v1546_v38 }
 0x154   : > { %833 = vmatprep.subr.bf16.mxu1 %v1301_v41 }
 0x155   : > { %v904_v40 = vunpack.c.0.s8 %v903_v39 }
 0x157   : > { %834 = vmatpush1.bf16.msra.mxu1 %v1299_v43  ;;  %v907_v43 = vsub.s32 %v904_v40, %v771_v4 }
 0x158   : > { %835 = vmatprep.subr.bf16.mxu1 %v1307_v44 }
 0x15b   : > { %836 = vmatpush1.bf16.msra.mxu1 %v1305_v45 }
 0x15c   : > { %837 = vmatprep.subr.bf16.mxu1 %v1313_v46 }
 0x15f   : > { %838 = vmatpush1.bf16.msra.mxu1 %v1311_v47 }
 0x160   : > { %839 = vmatprep.subr.bf16.mxu1 %v1319_v48 }
 0x163   : > { %840 = vmatpush1.bf16.msra.mxu1 %v1317_v49 }
 0x164   : > { %841 = vmatprep.subr.bf16.mxu1 %v1325_v50 }
 0x167   : > { %842 = vmatpush1.bf16.msra.mxu1 %v1323_v51 }
 0x168   : > { %843 = vmatprep.subr.bf16.mxu1 %v1331_v52 }
 0x16b   : > { %844 = vmatpush1.bf16.msra.mxu1 %v1329_v53 }
 0x16c   : > { %845 = vmatprep.subr.bf16.mxu1 %v1337_v55 }
 0x16f   : > { %846 = vmatpush1.bf16.msra.mxu1 %v1335_v57 }
 0x212   : > { %v568_v60 = vpop.f32.mrf.mxu1 }
 0x213   : > { %v569_v61 = vadd.f32 %v568_v60, %v485_v59 }
 0x214   : > { %v1186_v62 = vpop.f32.mrf.mxu1 }
 0x215   : > { %v574_v63 = vmax.f32 %v569_v61, 0.0 }
 0x216   : > { %v571_v0 = vpop.f32.mrf.mxu1 }
 0x217   : > { %v575_v1 = vpack.c.bf16 %v574_v63, %v574_v63 }
 0x218   : > { %v1187_v2 = vpop.f32.mrf.mxu1 }
 0x219   : > { %823 = vmatmul.mubr.bf16.vlgmr.msra.gmra.mxu0 %v575_v1  ;;  %864 = vmatmul.mubr.bf16.vlgmr.msra.gmra.mxu1 %v575_v1 }
 0x2d9   : > { %v824_v14 = vpop.f32.mrf.mxu0  ;;  %v865_v15 = vpop.f32.mrf.mxu1 }
 0x2da   : > { %v825_v16 = vadd.f32 %v824_v14, %v773_v10  ;;  %v866_v17 = vadd.f32 %v865_v15, %v781_v11 }
 0x2db   : > { %v826_v18 = vpop.f32.mrf.mxu0  ;;  %v867_v19 = vpop.f32.mrf.mxu1 }
 0x2dc   : > { %v1119_v20 = vmul.f32 -1.442695, %v825_v16  ;;  %v1121_v21 = vmul.f32 -1.442695, %v866_v17  ;;  %v827_v22 = vadd.f32 %v826_v18, %v777_v12  ;;  %v868_v23 = vadd.f32 %v867_v19, %v785_v13 }
 0x2dd   : > { %v828_v24 = vpop.f32.mrf.mxu0  ;;  %v869_v25 = vpop.f32.mrf.mxu1 }
 0x2de   : > { %1338 = vpow2.f32 %v1119_v20  ;;  %v1120_v26 = vmul.f32 -1.442695, %v827_v22  ;;  %v1122_v27 = vmul.f32 -1.442695, %v868_v23 }
 0x2df   : > { %1340 = vpow2.f32 %v1121_v21  ;;  %v829_v28 = vpop.f32.mrf.mxu0  ;;  %v870_v29 = vpop.f32.mrf.mxu1 }
 0x2e0   : > { %1342 = vpow2.f32 %v1120_v26 }
 0x2e1   : > { %1344 = vpow2.f32 %v1122_v27 }
 0x2eb   : > { %v1339_v30 = vpop.eup %1338 }
 0x2ec   : > { %v1341_v31 = vpop.eup %1340  ;;  %v884_v32 = vadd.f32 1.0, %v1339_v30 }
 0x2ed   : > { %v1343_v33 = vpop.eup %1342  ;;  %v886_v34 = vadd.f32 1.0, %v1341_v31 }
 0x2ee   : > { %v1345_v35 = vpop.eup %1344  ;;  %1346 = vrcp.f32 %v884_v32  ;;  %v885_v36 = vadd.f32 1.0, %v1343_v33 }
 0x2ef   : > { %1348 = vrcp.f32 %v886_v34  ;;  %v887_v37 = vadd.f32 1.0, %v1345_v35 }
 0x2f0   : > { %1350 = vrcp.f32 %v885_v36 }
 0x2f1   : > { %1352 = vrcp.f32 %v887_v37 }
 0x2fb   : > { %v1347_v41 = vpop.eup %1346 }
 0x2fc   : > { %v1349_v42 = vpop.eup %1348 }
 0x2fd   : > { %v1351_v44 = vpop.eup %1350 }
 0x2fe   : > { %v1353_v45 = vpop.eup %1352  ;;  %v900_v46 = vcombine.low %v1347_v41, %v1351_v44 }
 0x2ff   : > { %v901_v47 = vcombine.low %v1349_v42, %v1353_v45 }
 0x300   : > { %v908_v48 = vrot.slane %v900_v46, %v907_v43 }
 0x301   : > { %v915_v49 = vrot.slane %v901_v47, %v907_v43 }
 0x303   : > { %v916_v50 = vcombine.low %v908_v48, %v915_v49 }
 0x305   : > { %v923_v51 = vrot.slane %v916_v50, %v907_v43 }
 0x307   : > { %929 = vst.msk [vmem:[%s352_s18] sm:$0xf] %vm927_vm1, %v923_v51 }
 0x308   : > { %1473 = shalt.err (!%p1470_p2)
}
 0x309   : > { %s1474_s0 = scalar_lea.hbm %s943_s10, 64  ;;  %s1478_s19 = scalar_lea.hbm %s1838_s7, 128 }
 0x30a   : > { %p1475_p1 = scmp.ne.s32.totalorder %s943_s10, %s1474_s0  ;;  %p1479_p13 = scmp.lt.s32.totalorder %s943_s10, %s1838_s7 }
 0x30b   : > { %p1480_p8 = scmp.lt.s32.totalorder %s1478_s19, %s1474_s0 }
 0x30c   : > { %p1476_p5 = pnand %p1475_p1, %p1863_p11 }
 0x30d   : > { %p1481_p3 = por %p1480_p8, %p1479_p13 }
 0x30e   : > { %p1477_p6 = pneg %p1476_p5 }
 0x310   : > { %p1482_p4 = pnand %p1481_p3, %p1477_p6 }
 0x312   : > { %1485 = shalt.err (!%p1482_p4)
}
 0x313   : > { %1202 = dma.vmem_to_hbm [thread:$0]  (%p1863_p11), %s946_s20, 64, %s943_s10, %s931_s15  }
 0x314 PF: > { %s957_s17 = sand.u32 1, %s1520_s24   ;;  %p1864_p0 = scmp.ne.s32.totalorder %s1850_s14, 0 }
 0x315   : > { %p1865_p12 = scmp.ge.s32.totalorder %s1532_s27, 2  ;;  %s958_s21 = scalar_lea.sflag [#allocation4], %s957_s17 }
 0x317   : > { %p1219_p9 = pnand %p1865_p12, %p1864_p0 }
 0x319   : > { %p1220_p7 = pneg %p1219_p9 }
 0x31b   : > { %1515 = dma.done.wait (%p1220_p7), %s958_s21, 64  }
 0x31c   : > { %1517 = vsyncadd (%p1220_p7), %s958_s21, 4294967232  ;;  %s1866_s18 = sld [smem:[#allocation15_spill]]  ;;  %p22_p10 = scmp.ge.s32.totalorder %s1613_s30, 4  }
 0x31d   : > { %s1867_s24 = smov %s1524_s25  ;;  %s1868_s25 = smov %s1528_s26 }
 0x31e   : > { %s1870_s27 = smov %s1613_s30  ;;  %24 = sbr.rel (!%p22_p10) target bundleno = 10 (0xa), region = 109 }
 0x322   : > { %s1869_s26 = smov %s1866_s18 }
 0x323   :  { %963 = vsyncpa [#allocation3], 1 }
 0x324   :  { %965 = vsyncpa [#allocation3 + $0x1], 1 }
 0x325   :  { %966 = vsyncpa [#allocation6], 1 }
 0x326   :  { %967 = vsyncpa [#allocation9], 1 }
 0x327   :  { %969 = vsyncpa [#allocation9 + $0x1], 1 }
 0x328   :  { %970 = vsyncpa [#allocation4], 1 }
 0x329   :  { %972 = vsyncpa [#allocation4 + $0x1], 1 }

</bundles_post_ra>
